<compile_context>
chip_gen: v5e
topology: v5e:2x2
jax: 0.10.0
libtpu: 0.0.40
codegen_flags: <defaults>
</compile_context>

<pallas_src>
import math
import functools

import jax
import jax.numpy as jnp
from jax import lax
from jax.experimental import pallas as pl
from jax.experimental.pallas import tpu as pltpu


# --------------------------- parameter setup (glue) ---------------------------
def make_positional_encoding(emb_size: int, max_len: int = 5000) -> jnp.ndarray:
    """(max_len, emb_size) sinusoidal table, same math as the PyTorch module."""
    position = jnp.arange(0, max_len, dtype=jnp.float32)[:, None]            # (L, 1)
    div_term = jnp.exp(
        jnp.arange(0, emb_size, 2, dtype=jnp.float32)
        * (-(math.log(10000.0) / emb_size))
    )                                                                         # (ceil(E/2),)
    angles = position * div_term                                              # (L, ceil(E/2))
    pe = jnp.zeros((max_len, emb_size), dtype=jnp.float32)
    pe = pe.at[:, 0::2].set(jnp.sin(angles))
    pe = pe.at[:, 1::2].set(jnp.cos(angles[:, : emb_size // 2]))              # odd-E safe
    return pe


# ------------------------------ tiling helpers --------------------------------
def _pick_row_tile(rows: int, max_rows: int = 256) -> int:
    # Sublane dim: either the full extent or a multiple of 8.
    return rows if rows <= max_rows else (max_rows // 8) * 8


def _pick_col_tile(cols: int, max_cols: int = 2048) -> int:
    # Lane dim: either the full extent or a multiple of 128 (~1 MiB f32 tiles).
    return cols if cols <= max_cols else (max_cols // 128) * 128


# ------------------------- eval-mode kernel (no dropout) -----------------------
def _pe_add_kernel(x_ref, pe_ref, o_ref):
    # x_ref: (TM, TC)   pe_ref: (1, TC)   o_ref: (TM, TC)
    o_ref[...] = x_ref[...] + pe_ref[...]          # (1,TC) broadcasts over sublanes


# ------------------------ train-mode kernel (with dropout) ---------------------
def _pe_add_dropout_kernel(seed_ref, x_ref, pe_ref, o_ref, *, p, total_cols, tm, tc):
    # seed_ref: SMEM scalar-prefetch (1,) int32
    y = x_ref[...] + pe_ref[...]

    # Stateless per-element RNG: hash(seed, global flat index).
    c = pl.program_id(0)                 # column-tile index (outer axis)
    r = pl.program_id(1)                 # row-tile index (inner axis)
    rows = lax.broadcasted_iota(jnp.int32, (tm, tc), 0) + r * tm
    cols = lax.broadcasted_iota(jnp.int32, (tm, tc), 1) + c * tc
    gidx = (rows * total_cols + cols).astype(jnp.uint32)

    seed = seed_ref[0].astype(jnp.uint32) * jnp.uint32(0x9E3779B9)
    h = gidx ^ seed
    h = h ^ (h >> 16)
    h = h * jnp.uint32(0x85EBCA6B)
    h = h ^ (h >> 13)
    h = h * jnp.uint32(0xC2B2AE35)
    h = h ^ (h >> 16)

    # keep with probability (1 - p): compare raw bits against a uint32 threshold.
    thr = jnp.uint32(min(int(round(p * 2.0 ** 32)), 2 ** 32 - 1))
    keep = h >= thr
    scale = jnp.float32(1.0 / (1.0 - p))
    o_ref[...] = jnp.where(keep, y * scale, jnp.zeros_like(y)).astype(o_ref.dtype)


# --------------------------------- wrappers ------------------------------------
def positional_encoding_eval(x: jnp.ndarray, pe_full: jnp.ndarray) -> jnp.ndarray:
    B, S, E = x.shape
    C = S * E
    x2 = x.reshape(B, C)                                   # lane-dense 2D view
    pe2 = pe_full[:S, :].astype(x.dtype).reshape(1, C)
    TM, TC = _pick_row_tile(B), _pick_col_tile(C)
    grid = (pl.cdiv(C, TC), pl.cdiv(B, TM))                # pe-changing axis outermost
    bytes_accessed = 2 * x2.size * x2.dtype.itemsize + pe2.size * pe2.dtype.itemsize

    out2 = pl.pallas_call(
        _pe_add_kernel,
        out_shape=jax.ShapeDtypeStruct((B, C), x.dtype),
        grid_spec=pltpu.PrefetchScalarGridSpec(
            num_scalar_prefetch=0,
            grid=grid,
            in_specs=[
                pl.BlockSpec((TM, TC), lambda c, r: (r, c)),
                pl.BlockSpec((1, TC), lambda c, r: (0, c)),
            ],
            out_specs=pl.BlockSpec((TM, TC), lambda c, r: (r, c)),
        ),
        compiler_params=pltpu.CompilerParams(
            dimension_semantics=("parallel", "parallel")),
        cost_estimate=pl.CostEstimate(
            flops=B * C, transcendentals=0, bytes_accessed=bytes_accessed),
    )(x2, pe2)
    return out2.reshape(B, S, E)


def positional_encoding_train(
    x: jnp.ndarray, pe_full: jnp.ndarray, p: float, seed: int
) -> jnp.ndarray:
    if p <= 0.0:
        return positional_encoding_eval(x, pe_full)
    B, S, E = x.shape
    C = S * E
    x2 = x.reshape(B, C)
    pe2 = pe_full[:S, :].astype(x.dtype).reshape(1, C)
    TM, TC = _pick_row_tile(B), _pick_col_tile(C)
    grid = (pl.cdiv(C, TC), pl.cdiv(B, TM))
    seed_arr = jnp.asarray([seed], dtype=jnp.int32)
    kernel = functools.partial(
        _pe_add_dropout_kernel, p=float(p), total_cols=C, tm=TM, tc=TC)
    bytes_accessed = 2 * x2.size * x2.dtype.itemsize + pe2.size * pe2.dtype.itemsize

    out2 = pl.pallas_call(
        kernel,
        out_shape=jax.ShapeDtypeStruct((B, C), x.dtype),
        grid_spec=pltpu.PrefetchScalarGridSpec(
            num_scalar_prefetch=1,
            grid=grid,
            in_specs=[
                pl.BlockSpec((TM, TC), lambda c, r, seed_ref: (r, c)),
                pl.BlockSpec((1, TC), lambda c, r, seed_ref: (0, c)),
            ],
            out_specs=pl.BlockSpec((TM, TC), lambda c, r, seed_ref: (r, c)),
        ),
        compiler_params=pltpu.CompilerParams(
            dimension_semantics=("parallel", "parallel")),
        cost_estimate=pl.CostEstimate(
            flops=2 * B * C, transcendentals=0, bytes_accessed=bytes_accessed),
    )(seed_arr, x2, pe2)
    return out2.reshape(B, S, E)


if __name__ == "__main__":
    # Small shapes consistent with the module's forward: (batch, seq, emb).
    B, S, E = 2, 8, 32
    dropout_p = 0.1
    max_len = 64

    key = jax.random.PRNGKey(0)
    x = jax.random.normal(key, (B, S, E), dtype=jnp.float32)
    pe_full = make_positional_encoding(E, max_len)          # (max_len, E)

    # Eval-mode forward (dropout is identity): verify against a pure-JAX reference.
    out_eval = jax.block_until_ready(positional_encoding_eval(x, pe_full))
    ref = x + pe_full[None, :S, :]
    assert out_eval.shape == (B, S, E)
    assert jnp.allclose(out_eval, ref, atol=1e-6, rtol=1e-6)

    # Train-mode forward (dropout active): check masking/scaling invariants.
    out_train = jax.block_until_ready(
        positional_encoding_train(x, pe_full, dropout_p, seed=1234))
    assert out_train.shape == (B, S, E)
    scaled = ref / (1.0 - dropout_p)
    is_zero = jnp.isclose(out_train, 0.0, atol=1e-6)
    is_scaled = jnp.isclose(out_train, scaled, atol=1e-5, rtol=1e-5)
    assert bool(jnp.all(is_zero | is_scaled))   # every element is dropped or scaled
    assert bool(jnp.any(is_zero))               # some elements dropped
    assert bool(jnp.any(~is_zero))              # some elements kept

    print("KERNEL_OK")
</pallas_src>

<mosaic_0001>
module attributes {stable_mosaic.version = 11 : i64} {
  func.func @_pe_add_kernel(%arg0: i32, %arg1: i32, %arg2: memref<2x256xf32, #tpu.memory_space<vmem>>, %arg3: memref<1x256xf32, #tpu.memory_space<vmem>>, %arg4: memref<2x256xf32, #tpu.memory_space<vmem>>) attributes {dimension_semantics = [#tpu.dimension_semantics<parallel>, #tpu.dimension_semantics<parallel>], iteration_bounds = array<i64: 1, 1>, scalar_prefetch = 0 : i64, scratch_operands = 0 : i64, tpu.core_type = #tpu.core_type<tc>, window_params = [{transform_indices = @transform_0, window_bounds = array<i64: 2, 256>}, {transform_indices = @transform_1, window_bounds = array<i64: 1, 256>}, {transform_indices = @transform_2, window_bounds = array<i64: 2, 256>}]} {
    %c0 = arith.constant 0 : index
    %c0_0 = arith.constant 0 : index
    %0 = vector.load %arg2[%c0, %c0_0] : memref<2x256xf32, #tpu.memory_space<vmem>>, vector<2x256xf32>
    %c0_1 = arith.constant 0 : index
    %c0_2 = arith.constant 0 : index
    %1 = vector.load %arg3[%c0_1, %c0_2] : memref<1x256xf32, #tpu.memory_space<vmem>>, vector<1x256xf32>
    %2 = vector.broadcast %1 : vector<1x256xf32> to vector<2x256xf32>
    %3 = arith.addf %0, %2 : vector<2x256xf32>
    %c0_3 = arith.constant 0 : index
    %c0_4 = arith.constant 0 : index
    %4 = vector.load %arg4[%c0_3, %c0_4] : memref<2x256xf32, #tpu.memory_space<vmem>>, vector<2x256xf32>
    tpu.vector_store %arg4[%c0_3, %c0_4], %3 {strides = array<i32>} : memref<2x256xf32, #tpu.memory_space<vmem>>, vector<2x256xf32>,
    return
  }
  func.func @transform_0(%arg0: i32, %arg1: i32) -> (i32, i32) {
    %c0_i32 = arith.constant 0 : i32
    return %arg1, %arg0 : i32, i32
  }
  func.func @transform_1(%arg0: i32, %arg1: i32) -> (i32, i32) {
    %c0_i32 = arith.constant 0 : i32
    %c0_i32_0 = arith.constant 0 : i32
    return %c0_i32, %arg0 : i32, i32
  }
  func.func @transform_2(%arg0: i32, %arg1: i32) -> (i32, i32) {
    %c0_i32 = arith.constant 0 : i32
    return %arg1, %arg0 : i32, i32
  }
}

</mosaic_0001>

<bundles_post_ra>
// kernel: tpu_custom_call.1
= control target key start
LH: loop header
LB: loop body
LE: loop exit
PB: predicated region body
PF: predicated region fallthrough
CT: control target
= control target key end

     0   :  { %7 = vsyncpa [#allocation3], 0  ;;  %s177_s0 = inlined_call_operand.hbm [shape: f32[2,256], index: 0, kind: input, shape index: {}]   ;;  %s178_s1 = inlined_call_operand.hbm [shape: f32[1,256], index: 1, kind: input, shape index: {}]   ;;  %s179_s2 = inlined_call_operand.hbm [shape: f32[2,256], index: 2, kind: output, shape index: {}]  }
   0x1   :  { %8 = vsyncpa [#allocation6], 0 }
   0x2   :  { %9 = vsyncpa [#allocation4], 0  ;;  %s15_s11 = sshll.u32 %s177_s0, 4  ;;  %s150_s12 = smov [#allocation2]   ;;  %s16_s11 = int_to_ptr.hbm [resolvable:$true] %s15_s11 }
   0x3   :  { %s17_s13 = sshll.u32 %s150_s12, 4  ;;  %s26_s16 = sshll.u32 %s178_s1, 4  ;;  %s18_s13 = int_to_ptr.vmem [resolvable:$true] %s17_s13  ;;  %s27_s16 = int_to_ptr.hbm [resolvable:$true] %s26_s16 }
   0x4   :  { %20 = dma.hbm_to_vmem [thread:$0]  %s16_s11, 64, %s18_s13, [#allocation3]  }
   0x5   :  { %s151_s17 = smov [#allocation5]  }
   0x6   :  { %s28_s18 = sshll.u32 %s151_s17, 4  ;;  %s29_s18 = int_to_ptr.vmem [resolvable:$true] %s28_s18 }
   0x7   :  { %31 = dma.hbm_to_vmem [thread:$0]  %s27_s16, 32, %s29_s18, [#allocation6]  }
   0x8   :  { %144 = dma.done.wait [#allocation3], 64  }
   0x9   :  { %145 = vsyncadd [#allocation3], 4294967232 }
   0xa   :  { %146 = dma.done.wait [#allocation6], 32  }
   0xb   :  { %147 = vsyncadd [#allocation6], 4294967264  ;;  %v41_v0 = vld [vmem:[#allocation5] sm:$0x3]  ;;  %vm46_vm0 = vcmask 1041408   ;;  %s152_s0 = smov [#allocation7]  }
   0xc   :  { %v43_v1 = vperm.slane %v41_v0, 0  ;;  %v44_v2 = vperm.slane %v41_v0, 1  ;;  %v40_v3 = vld [vmem:[#allocation2] sm:$0xf]  ;;  %s56_s19 = sshll.u32 %s152_s0, 4  ;;  %s58_s21 = sshll.u32 %s179_s2, 4  ;;  %s57_s19 = int_to_ptr.vmem [resolvable:$true] %s56_s19  ;;  %s59_s21 = int_to_ptr.hbm [resolvable:$true] %s58_s21 }
   0xe   :  { %v45_v4 = vrot.slane %v44_v2, 6 }
  0x10   :  { %v47_v5 = vsel %vm46_vm0, %v43_v1, %v45_v4 }
  0x11   :  { %v49_v6 = vadd.f32 %v47_v5, %v40_v3 }
  0x13   :  { %50 = vst [vmem:[#allocation7] sm:$0xf] %v49_v6 }
  0x14   :  { %61 = dma.vmem_to_hbm [thread:$0]  %s57_s19, 64, %s59_s21, [#allocation4]  }
  0x15   :  { %148 = dma.done.wait [#allocation4], 64  }
  0x16   :  { %149 = vsyncadd [#allocation4], 4294967232 }
  0x17   :  { %66 = vsyncpa [#allocation3], 1 }
  0x18   :  { %67 = vsyncpa [#allocation6], 1 }
  0x19   :  { %68 = vsyncpa [#allocation4], 1 }

</bundles_post_ra>
